<compile_context>
chip_gen: v6e
topology: v6e:2x2x1
jax: 0.10.0
libtpu: 0.0.40
codegen_flags: <defaults>
</compile_context>

<pallas_src>
import jax
import jax.numpy as jnp
from jax.experimental import pallas as pl
from jax.experimental.pallas import tpu as pltpu


def _round_up(x, m):
    return (x + m - 1) // m * m


def _make_kernel(use_matmul):
    def kernel(scalars_ref, z_ref, w_ref, o_ref):
        # scalars_ref: SMEM (2,) f32 -> [bias, c] with c = weight . scale
        b = scalars_ref[0]
        c = scalars_ref[1]
        z = z_ref[...].astype(jnp.float32)            # (TB, Dk)
        w = w_ref[...].astype(jnp.float32)            # (Dk, k) or (1, Dk)
        if use_matmul:
            # Folded path: per-row dot products as one matmul against a
            # block-diagonal weight matrix on the otherwise-idle MXU.
            act = jnp.dot(z, w, preferred_element_type=jnp.float32) + b   # (TB, k)
        else:
            # Generic path: VPU multiply + XLU lane reduce.
            act = jnp.sum(z * w, axis=-1, keepdims=True) + b              # (TB, 1)
        t = jnp.tanh(act)
        det_grad = 1.0 + (1.0 - t * t) * c
        o_ref[...] = jnp.log(jnp.abs(det_grad) + 1e-9).astype(o_ref.dtype)

    return kernel


def _logdet_jnp(z, w32, b32_row, c):
    act = z.astype(jnp.float32) @ w32.T + b32_row
    t = jnp.tanh(act)
    det_grad = 1.0 + (1.0 - t * t) * c
    return jnp.log(jnp.abs(det_grad) + 1e-9)


def _choose_batch_tile(rows, bytes_per_row, target_block_bytes):
    tb = max(8, int(target_block_bytes) // max(1, int(bytes_per_row)))
    # Keep >= 2 grid steps when there is real work so the "parallel" batch
    # axis can actually be sharded across TensorCores (megacore / v7x 2-TC).
    if rows > 512:
        tb = min(tb, _round_up(pl.cdiv(rows, 2), 8))
    if tb >= rows:
        return rows                     # single block == full dim (always legal)
    align = 128 if tb >= 256 else 8     # 128 keeps output DMA / lanes clean
    return max(8, (tb // align) * align)


def planar_flow_logdet(z, weight, bias, scale, *,
                       target_block_bytes=4 << 20,
                       min_pallas_bytes=256 << 10,
                       force_pallas=False):
    """z: (B, D); weight: (1, D); bias: (1,); scale: (1, D) -> (B, 1) float32."""
    B, D = z.shape
    w32 = weight.astype(jnp.float32).reshape(1, D)
    s32 = scale.astype(jnp.float32).reshape(1, D)
    b32 = bias.astype(jnp.float32).reshape(1)
    c = jnp.sum(w32 * s32)              # psi @ scale.T == (1 - tanh(a)^2) * c

    z_itemsize = int(jnp.dtype(z.dtype).itemsize)

    # Tiny problems (incl. the module's B=2, D=32): custom-call launch +
    # pipeline setup dwarfs ~hundreds of bytes of work -> plain fused jnp.
    if not force_pallas and B * D * z_itemsize < min_pallas_bytes:
        return _logdet_jnp(z, w32, b32[None, :], c)

    scalars = jnp.stack([b32[0], c])    # (2,) f32 -> SMEM scalar path

    # Lane fold: pack k rows into the 128-lane vreg when D divides 128.
    k = 128 // D if (D < 128 and 128 % D == 0) else 1
    if k > 1 and B % k != 0:
        k = 1   # avoid any wrapper-side copy of z for a ragged remainder

    if k > 1:
        rows, dk = B // k, k * D
        z_in = z.reshape(rows, dk)                       # contiguous -> free
        # Block-diagonal weights: w_in[j*D + d, j] = w[d]
        eye = jnp.eye(k, dtype=jnp.float32)
        w_in = (eye[:, None, :] * w32[0][None, :, None]).reshape(dk, k)
        w_block = (dk, k)
        use_matmul = True
    else:
        rows, dk = B, D
        z_in = z
        w_in = w32                                       # (1, D) row
        w_block = (1, D)
        use_matmul = False

    # Physical per-row VMEM footprint (lane dim pads to 128) for the z block
    # (input dtype) and the (TB, k) f32 output block; both are double-buffered.
    bytes_per_row = _round_up(dk, 128) * z_itemsize + _round_up(k, 128) * 4
    tb = _choose_batch_tile(rows, bytes_per_row, target_block_bytes)
    grid = (pl.cdiv(rows, tb),)

    cost = pl.CostEstimate(
        flops=2 * rows * dk * k + 6 * rows * k,
        transcendentals=2 * rows * k,                    # tanh + log
        bytes_accessed=rows * dk * z_itemsize + rows * k * 4 + w_in.size * 4 + 8,
    )

    out = pl.pallas_call(
        _make_kernel(use_matmul),
        out_shape=jax.ShapeDtypeStruct((rows, k), jnp.float32),
        grid_spec=pltpu.PrefetchScalarGridSpec(
            num_scalar_prefetch=0,
            grid=grid,
            in_specs=[
                # [bias, weight.scale] on the scalar path.
                pl.BlockSpec(memory_space=pltpu.MemorySpace.SMEM),
                # z streamed in batch tiles (double-buffered by the pipeline;
                # ragged last tile is clipped by Pallas, no jnp.pad copy).
                pl.BlockSpec((tb, dk), lambda i: (i, 0)),
                # Weights, resident across the whole grid.
                pl.BlockSpec(w_block, lambda i: (0, 0)),
            ],
            out_specs=pl.BlockSpec((tb, k), lambda i: (i, 0)),
        ),
        compiler_params=pltpu.CompilerParams(
            dimension_semantics=("parallel",),
        ),
        cost_estimate=cost,
    )(scalars, z_in, w_in)

    # (rows, k) row-major == original batch order -> (B, 1).
    return out.reshape(B, 1)


def reference(z, weight, bias, scale):
    activation = z @ weight.T + bias[None, :]
    psi = (1.0 - jnp.tanh(activation) ** 2) * weight
    det_grad = 1.0 + psi @ scale.T
    return jnp.log(jnp.abs(det_grad) + 1e-9)


if __name__ == "__main__":
    key = jax.random.PRNGKey(0)
    kz, kw, kb, ks = jax.random.split(key, 4)

    # Module-consistent shapes: batch=2, hidden=32.
    D = 32
    weight = jax.random.normal(kw, (1, D), dtype=jnp.float32) * 0.1
    bias = jax.random.normal(kb, (1,), dtype=jnp.float32) * 0.1
    scale = jax.random.normal(ks, (1, D), dtype=jnp.float32) * 0.1

    # 1) B=2, D=32 forced through the Pallas path (single clipped block).
    z1 = jax.random.normal(kz, (2, D), dtype=jnp.float32)
    o1 = jax.block_until_ready(
        planar_flow_logdet(z1, weight, bias, scale, force_pallas=True))
    assert o1.shape == (2, 1)
    assert jnp.allclose(o1, reference(z1, weight, bias, scale), atol=1e-4, rtol=1e-3)

    # 1b) Same input via the natural tiny-shape fallback.
    o1b = jax.block_until_ready(planar_flow_logdet(z1, weight, bias, scale))
    assert jnp.allclose(o1b, reference(z1, weight, bias, scale), atol=1e-5, rtol=1e-5)

    # 2) Folded path (D=32 -> k=4): multiple tiles + ragged last folded tile.
    z2 = jax.random.normal(kz, (1000, D), dtype=jnp.float32)
    o2 = jax.block_until_ready(
        planar_flow_logdet(z2, weight, bias, scale,
                           force_pallas=True, target_block_bytes=32 * 1024))
    assert o2.shape == (1000, 1)
    assert jnp.allclose(o2, reference(z2, weight, bias, scale), atol=1e-4, rtol=1e-3)

    # 3) Unfolded path (B % 4 != 0): multiple tiles + ragged last tile.
    z3 = jax.random.normal(kz, (530, D), dtype=jnp.float32)
    o3 = jax.block_until_ready(
        planar_flow_logdet(z3, weight, bias, scale,
                           force_pallas=True, target_block_bytes=16 * 1024))
    assert o3.shape == (530, 1)
    assert jnp.allclose(o3, reference(z3, weight, bias, scale), atol=1e-4, rtol=1e-3)

    # 4) D >= 128 path (no fold), multiple tiles.
    D4 = 256
    ka, kb2, kc, kd = jax.random.split(jax.random.PRNGKey(1), 4)
    w4 = jax.random.normal(kb2, (1, D4), dtype=jnp.float32) * 0.05
    b4 = jax.random.normal(kc, (1,), dtype=jnp.float32) * 0.1
    s4 = jax.random.normal(kd, (1, D4), dtype=jnp.float32) * 0.05
    z4 = jax.random.normal(ka, (96, D4), dtype=jnp.float32)
    o4 = jax.block_until_ready(
        planar_flow_logdet(z4, w4, b4, s4,
                           force_pallas=True, target_block_bytes=32 * 1024))
    assert o4.shape == (96, 1)
    assert jnp.allclose(o4, reference(z4, w4, b4, s4), atol=1e-4, rtol=1e-3)

    print("KERNEL_OK")
</pallas_src>

<mosaic_0001>
module attributes {stable_mosaic.version = 11 : i64} {
  func.func @kernel(%arg0: i32, %arg1: memref<2xf32, #tpu.memory_space<smem>>, %arg2: memref<2x32xf32, #tpu.memory_space<vmem>>, %arg3: memref<1x32xf32, #tpu.memory_space<vmem>>, %arg4: memref<2x1xf32, #tpu.memory_space<vmem>>) attributes {dimension_semantics = [#tpu.dimension_semantics<parallel>], iteration_bounds = array<i64: 1>, scalar_prefetch = 0 : i64, scratch_operands = 0 : i64, tpu.core_type = #tpu.core_type<tc>, window_params = [{transform_indices = @transform_0, window_bounds = array<i64: 2>}, {transform_indices = @transform_1, window_bounds = array<i64: 2, 32>}, {pipeline_mode = #tpu.pipeline_mode<synchronous>, transform_indices = @transform_2, window_bounds = array<i64: 1, 32>}, {transform_indices = @transform_3, window_bounds = array<i64: 2, 1>}]} {
    %c0 = arith.constant 0 : index
    %0 = memref.load %arg1[%c0] : memref<2xf32, #tpu.memory_space<smem>>
    %c1 = arith.constant 1 : index
    %1 = memref.load %arg1[%c1] : memref<2xf32, #tpu.memory_space<smem>>
    %c0_0 = arith.constant 0 : index
    %c0_1 = arith.constant 0 : index
    %2 = vector.load %arg2[%c0_0, %c0_1] : memref<2x32xf32, #tpu.memory_space<vmem>>, vector<2x32xf32>
    %c0_2 = arith.constant 0 : index
    %c0_3 = arith.constant 0 : index
    %3 = vector.load %arg3[%c0_2, %c0_3] : memref<1x32xf32, #tpu.memory_space<vmem>>, vector<1x32xf32>
    %4 = vector.broadcast %3 : vector<1x32xf32> to vector<2x32xf32>
    %5 = arith.mulf %2, %4 : vector<2x32xf32>
    %cst = arith.constant dense<0.000000e+00> : vector<2xf32>
    %6 = vector.multi_reduction <add>, %5, %cst [1] : vector<2x32xf32> to vector<2xf32>
    %7 = vector.shape_cast %6 : vector<2xf32> to vector<2x1xf32>
    %8 = vector.broadcast %0 : f32 to vector<2x1xf32>
    %9 = arith.addf %7, %8 : vector<2x1xf32>
    %10 = math.tanh %9 : vector<2x1xf32>
    %11 = arith.mulf %10, %10 : vector<2x1xf32>
    %cst_4 = arith.constant 1.000000e+00 : f32
    %12 = vector.broadcast %cst_4 : f32 to vector<2x1xf32>
    %13 = arith.subf %12, %11 : vector<2x1xf32>
    %14 = vector.broadcast %1 : f32 to vector<2x1xf32>
    %15 = arith.mulf %13, %14 : vector<2x1xf32>
    %cst_5 = arith.constant 1.000000e+00 : f32
    %16 = vector.broadcast %cst_5 : f32 to vector<2x1xf32>
    %17 = arith.addf %16, %15 : vector<2x1xf32>
    %18 = math.absf %17 : vector<2x1xf32>
    %cst_6 = arith.constant 9.99999971E-10 : f32
    %19 = vector.broadcast %cst_6 : f32 to vector<2x1xf32>
    %20 = arith.addf %18, %19 : vector<2x1xf32>
    %21 = math.log %20 : vector<2x1xf32>
    %c0_7 = arith.constant 0 : index
    %c0_8 = arith.constant 0 : index
    %22 = vector.load %arg4[%c0_7, %c0_8] : memref<2x1xf32, #tpu.memory_space<vmem>>, vector<2x1xf32>
    tpu.vector_store %arg4[%c0_7, %c0_8], %21 {strides = array<i32>} : memref<2x1xf32, #tpu.memory_space<vmem>>, vector<2x1xf32>,
    return
  }
  func.func @transform_0(%arg0: i32) -> i32 {
    %c0_i32 = arith.constant 0 : i32
    %c0_i32_0 = arith.constant 0 : i32
    return %c0_i32 : i32
  }
  func.func @transform_1(%arg0: i32) -> (i32, i32) {
    %c0_i32 = arith.constant 0 : i32
    %c0_i32_0 = arith.constant 0 : i32
    return %arg0, %c0_i32 : i32, i32
  }
  func.func @transform_2(%arg0: i32) -> (i32, i32) {
    %c0_i32 = arith.constant 0 : i32
    %c0_i32_0 = arith.constant 0 : i32
    %c0_i32_1 = arith.constant 0 : i32
    return %c0_i32, %c0_i32_0 : i32, i32
  }
  func.func @transform_3(%arg0: i32) -> (i32, i32) {
    %c0_i32 = arith.constant 0 : i32
    %c0_i32_0 = arith.constant 0 : i32
    return %arg0, %c0_i32 : i32, i32
  }
}

</mosaic_0001>

<bundles_post_ra>
// kernel: tpu_custom_call.1
= control target key start
LH: loop header
LB: loop body
LE: loop exit
PB: predicated region body
PF: predicated region fallthrough
CT: control target
= control target key end

     0   :  { %8 = vsyncpa [#allocation4], 0  ;;  %s146_s0 = inlined_call_operand.hbm [shape: f32[2], index: 0, kind: input, shape index: {}]   ;;  %s147_s1 = inlined_call_operand.hbm [shape: f32[2,32], index: 1, kind: input, shape index: {}]   ;;  %s148_s2 = inlined_call_operand.vmem [shape: f32[1,32], index: 2, kind: input, shape index: {}]   ;;  %s149_s3 = inlined_call_operand.vmem [shape: f32[2,1], index: 3, kind: output, shape index: {}]  }
   0x1   :  { %9 = vsyncpa [#allocation3], 0  ;;  %s112_s12 = smov [#allocation2]   ;;  %s113_s15 = smov [#allocation5]  }
   0x2   :  { %17 = dma.hbm_to_smem %s146_s0, 16, %s112_s12, [#allocation4]  }
   0x3   :  { %s24_s16 = sshll.u32 %s113_s15, 4  ;;  %s25_s16 = int_to_ptr.vmem [resolvable:$true] %s24_s16 }
   0x4   :  { %s96_s17 = scalar_lea.vmem %s25_s16, 32  ;;  %p101_p1 = scmp.lt.s32.totalorder %s25_s16, %s25_s16 }
   0x5   :  { %p97_p0 = scmp.ne.s32.totalorder %s25_s16, %s96_s17  ;;  %p102_p2 = scmp.lt.s32.totalorder %s96_s17, %s96_s17 }
   0x7   :  { %p103_p3 = por %p102_p2, %p101_p1 }
   0x9   :  { %p104_p4 = pnand %p103_p3, %p97_p0 }
   0xb   :  { %107 = shalt.err (!%p104_p4)
}
   0xc   :  { %27 = dma.hbm_to_vmem [thread:$0]  %s147_s1, 32, %s25_s16, [#allocation3]  }
   0xd   :  { %108 = dma.done.wait [#allocation4], 16  }
   0xe   :  { %109 = vsyncadd [#allocation4], 4294967280 }
   0xf   :  { %110 = dma.done.wait [#allocation3], 32  }
  0x10   :  { %111 = vsyncadd [#allocation3], 4294967264 }
  0x11   :  { %36 = sfence }
  0x12   :  { %v39_v0 = vld [vmem:[#allocation5] sm:$0x3]  ;;  %vm48_vm0 = vcmask 254976   ;;  %s37_s21 = sld [smem:[#allocation2]]  ;;  %vm64_vm1 = vcmask 1024  }
  0x13   :  { %v73_v1 = vld [vmem:[%s148_s2] ss:$0 sm:$0xff]  ;;  %s72_s1 = sld [smem:[#allocation2 + $0x1]] }
  0x14   :  { %v47_v2 = vmul.f32 %v73_v1, %v39_v0 }
  0x16   :  { %v49_v3 = vsel %vm48_vm0, %v47_v2, 0.0 }
  0x17   :  { %50 = vadd.xlane.f32.xlu0 %v49_v3 }
  0x18   :  { %v52_v4 = vstv %s37_s21 }
  0x19   :  { %v57_v9 = vstv %s72_s1 }
  0xa0   :  { %v51_v5 = vpop.xlane.xlu0 %50 }
  0xa1   :  { %v53_v6 = vadd.f32 %v52_v4, %v51_v5 }
  0xa3   :  { %76 = vtanh.f32 %v53_v6 }
  0xb0   :  { %v77_v7 = vpop.eup %76 }
  0xb1   :  { %v55_v8 = vmul.f32 %v77_v7, %v77_v7 }
  0xb3   :  { %v56_v10 = vsub.f32 1.0, %v55_v8 }
  0xb5   :  { %v58_v11 = vmul.f32 %v57_v9, %v56_v10 }
  0xb7   :  { %v59_v12 = vadd.f32 1.0, %v58_v11 }
  0xb9   :  { %v60_v13 = vand.u32 2147483647, %v59_v12 }
  0xbb   :  { %v61_v14 = vadd.f32 1e-09, %v60_v13 }
  0xbd   :  { %78 = vlog2.f32 %v61_v14 }
  0xca   :  { %v79_v15 = vpop.eup %78 }
  0xcb   :  { %v63_v16 = vmul.f32 0.6931472, %v79_v15 }
  0xcd   :  { %65 = vst.msk [vmem:[%s149_s3] sm:$0x3] %vm64_vm1, %v63_v16 }
  0xce   :  { %70 = vsyncpa [#allocation3], 1 }
  0xcf   :  { %71 = vsyncpa [#allocation4], 1 }

</bundles_post_ra>
